<compile_context>
chip_gen: v7x
topology: tpu7x:2x2x1
jax: 0.10.0
libtpu: 0.0.40
codegen_flags: <defaults>
</compile_context>

<pallas_src>
import jax
import jax.numpy as jnp
from jax.experimental import pallas as pl
from jax.experimental.pallas import tpu as pltpu


def _bse_kernel(x_ref, wmap_a_ref, wmap_m_ref, bmap_ref, wmb_ref, bmb_ref,
                o_ref):
    x = x_ref[...]                                   # (bt, C, HW), native dtype
    bt, C, _ = x.shape

    # AdaptiveAvgPool2d(1) / AdaptiveMaxPool2d(1): lane reductions,
    # mean accumulated in f32 (matters for bf16 inputs / large H*W).
    y_avg = jnp.mean(x, axis=-1, keepdims=True, dtype=jnp.float32)   # (bt, C, 1)
    y_max = jnp.max(x, axis=-1, keepdims=True).astype(jnp.float32)   # (bt, C, 1)

    # conv_map on cat([avg, max]) == W[:, :C] @ avg + W[:, C:] @ max + b.
    wa = wmap_a_ref[...]                                             # (mid, C)
    wm = wmap_m_ref[...]                                             # (mid, C)
    wa_b = jnp.broadcast_to(wa, (bt,) + wa.shape)                    # (bt, mid, C)
    wm_b = jnp.broadcast_to(wm, (bt,) + wm.shape)
    z = (jnp.einsum('bmc,bcx->bmx', wa_b, y_avg,
                    preferred_element_type=jnp.float32)
         + jnp.einsum('bmc,bcx->bmx', wm_b, y_max,
                      preferred_element_type=jnp.float32)
         + bmap_ref[...])                                            # (bt, mid, 1)

    # ReLU6
    z = jnp.clip(z, 0.0, 6.0)

    # Stacked conv_mul / conv_bias: one (2C, mid) weight, one batched matmul.
    wmb = wmb_ref[...]                                               # (2C, mid)
    wmb_b = jnp.broadcast_to(wmb, (bt,) + wmb.shape)                 # (bt, 2C, mid)
    t = (jnp.einsum('bcm,bmx->bcx', wmb_b, z,
                    preferred_element_type=jnp.float32)
         + bmb_ref[...])                                             # (bt, 2C, 1)

    t_mul = t[:, :C, :]                              # conv_mul pre-activation
    ybias = t[:, C:, :]                              # conv_bias output
    # LeakySigmoid: sigmoid(t) + 0.001 * t
    ymul = jax.nn.sigmoid(t_mul) + t_mul * 0.001

    # x * ymul + ybias, broadcast over the spatial (lane) axis.
    o_ref[...] = (x * ymul + ybias).astype(o_ref.dtype)


def biased_squeeze_and_excitation(x_nchw, params, *,
                                  target_block_bytes=2 * 1024 * 1024):
    """x_nchw: (B, C, H, W).  params: dict of 1x1-conv weights/biases."""
    B, C, H, W = x_nchw.shape
    HW = H * W
    mid = params["w_map"].shape[0]

    # Keep x in its native dtype: the kernel is HBM-bandwidth bound.
    x_flat = x_nchw.reshape(B, C, HW)

    # ---- choose how many batch elements go into one grid step -------------
    per_image_bytes = C * HW * x_flat.dtype.itemsize
    bt = max(1, min(B, target_block_bytes // max(per_image_bytes, 1)))
    if B >= 2:
        bt = max(1, min(bt, B // 2))      # keep >= 2 grid steps (v7x megacore)
    while B % bt:                         # exact blocks, no padded tail
        bt -= 1
    num_blocks = B // bt

    # ---- prepare (tiny) weights in f32 -------------------------------------
    f32 = jnp.float32
    w_map = params["w_map"].astype(f32)                   # (mid, 2C)
    w_map_a = w_map[:, :C]                                # avg half
    w_map_m = w_map[:, C:]                                # max half
    b_map = params["b_map"].astype(f32).reshape(mid, 1)
    w_mb = jnp.concatenate([params["w_mul"].astype(f32),
                            params["w_bias"].astype(f32)], axis=0)  # (2C, mid)
    b_mb = jnp.concatenate([params["b_mul"].astype(f32),
                            params["b_bias"].astype(f32)]).reshape(2 * C, 1)

    def w_spec(a):
        return pl.BlockSpec(a.shape, lambda i: (0, 0))

    x_spec = pl.BlockSpec((bt, C, HW), lambda i: (i, 0, 0))

    out = pl.pallas_call(
        _bse_kernel,
        out_shape=jax.ShapeDtypeStruct((B, C, HW), x_flat.dtype),
        grid_spec=pltpu.PrefetchScalarGridSpec(
            num_scalar_prefetch=0,
            grid=(num_blocks,),
            in_specs=[
                x_spec,
                w_spec(w_map_a), w_spec(w_map_m), w_spec(b_map),
                w_spec(w_mb), w_spec(b_mb),
            ],
            out_specs=pl.BlockSpec((bt, C, HW), lambda i: (i, 0, 0)),
        ),
        compiler_params=pltpu.CompilerParams(
            dimension_semantics=("parallel",),
            # 2 in-bufs + 2 out-bufs of a <=2 MiB block + tiny weights stays
            # far below this on every generation (v5e default is only 16 MiB,
            # v7x scoped default is 32 MiB of 64 MiB physical).
            vmem_limit_bytes=32 * 1024 * 1024),
    )(x_flat, w_map_a, w_map_m, b_map, w_mb, b_mb)

    return out.reshape(B, C, H, W)


def reference(x, params):
    """Plain-JAX reference reproducing the PyTorch forward."""
    y1 = jnp.mean(x, axis=(2, 3), keepdims=True)            # avgpool
    y2 = jnp.max(x, axis=(2, 3), keepdims=True)             # maxpool
    y = jnp.concatenate([y1, y2], axis=1)                   # (B, 2C, 1, 1)

    def conv1x1(v, w, b):  # v: (B, Cin, 1, 1), w: (Cout, Cin), b: (Cout,)
        r = jnp.einsum("oc,bc->bo", w, v[:, :, 0, 0]) + b
        return r[:, :, None, None]

    z = conv1x1(y, params["w_map"], params["b_map"])
    z = jnp.clip(z, 0.0, 6.0)
    t_mul = conv1x1(z, params["w_mul"], params["b_mul"])
    ymul = jax.nn.sigmoid(t_mul) + t_mul * 0.001
    ybias = conv1x1(z, params["w_bias"], params["b_bias"])
    return x * ymul + ybias


if __name__ == "__main__":
    B, C, MID, H, W = 4, 4, 8, 16, 16

    key = jax.random.PRNGKey(0)
    kx, k1, k2, k3, k4, k5, k6 = jax.random.split(key, 7)

    x = jax.random.normal(kx, (B, C, H, W), dtype=jnp.float32)

    # Deterministic synthetic parameters (1x1 conv weights squeezed to 2D).
    params = {
        "w_map":  0.3 * jax.random.normal(k1, (MID, 2 * C), dtype=jnp.float32),
        "b_map":  0.1 * jax.random.normal(k2, (MID,), dtype=jnp.float32),
        "w_mul":  0.3 * jax.random.normal(k3, (C, MID), dtype=jnp.float32),
        "b_mul":  0.1 * jax.random.normal(k4, (C,), dtype=jnp.float32),
        "w_bias": 0.3 * jax.random.normal(k5, (C, MID), dtype=jnp.float32),
        "b_bias": 0.1 * jax.random.normal(k6, (C,), dtype=jnp.float32),
    }

    out = biased_squeeze_and_excitation(x, params)
    out = jax.block_until_ready(out)

    ref = jax.block_until_ready(reference(x, params))
    assert out.shape == (B, C, H, W)
    assert jnp.max(jnp.abs(out - ref)) < 1e-4, "mismatch vs reference"

    print("KERNEL_OK")
</pallas_src>

<mosaic_0001>
module attributes {stable_mosaic.version = 11 : i64} {
  func.func @_bse_kernel(%arg0: i32, %arg1: memref<2x4x256xf32, #tpu.memory_space<vmem>>, %arg2: memref<8x4xf32, #tpu.memory_space<vmem>>, %arg3: memref<8x4xf32, #tpu.memory_space<vmem>>, %arg4: memref<8x1xf32, #tpu.memory_space<vmem>>, %arg5: memref<8x8xf32, #tpu.memory_space<vmem>>, %arg6: memref<8x1xf32, #tpu.memory_space<vmem>>, %arg7: memref<2x4x256xf32, #tpu.memory_space<vmem>>) attributes {dimension_semantics = [#tpu.dimension_semantics<parallel>], iteration_bounds = array<i64: 2>, scalar_prefetch = 0 : i64, scratch_operands = 0 : i64, tpu.core_type = #tpu.core_type<tc>, window_params = [{transform_indices = @transform_0, window_bounds = array<i64: 2, 4, 256>}, {pipeline_mode = #tpu.pipeline_mode<synchronous>, transform_indices = @transform_1, window_bounds = array<i64: 8, 4>}, {pipeline_mode = #tpu.pipeline_mode<synchronous>, transform_indices = @transform_2, window_bounds = array<i64: 8, 4>}, {pipeline_mode = #tpu.pipeline_mode<synchronous>, transform_indices = @transform_3, window_bounds = array<i64: 8, 1>}, {pipeline_mode = #tpu.pipeline_mode<synchronous>, transform_indices = @transform_4, window_bounds = array<i64: 8, 8>}, {pipeline_mode = #tpu.pipeline_mode<synchronous>, transform_indices = @transform_5, window_bounds = array<i64: 8, 1>}, {transform_indices = @transform_6, window_bounds = array<i64: 2, 4, 256>}]} {
    %c0 = arith.constant 0 : index
    %c0_0 = arith.constant 0 : index
    %c0_1 = arith.constant 0 : index
    %0 = vector.load %arg1[%c0, %c0_0, %c0_1] : memref<2x4x256xf32, #tpu.memory_space<vmem>>, vector<2x4x256xf32>
    %cst = arith.constant dense<0.000000e+00> : vector<2x4xf32>
    %1 = vector.multi_reduction <add>, %0, %cst [2] : vector<2x4x256xf32> to vector<2x4xf32>
    %2 = vector.shape_cast %1 : vector<2x4xf32> to vector<2x4x1xf32>
    %cst_2 = arith.constant 2.560000e+02 : f32
    %3 = vector.broadcast %cst_2 : f32 to vector<2x4x1xf32>
    %4 = arith.divf %2, %3 : vector<2x4x1xf32>
    %cst_3 = arith.constant dense<0xFF800000> : vector<2x4xf32>
    %5 = vector.multi_reduction <maximumf>, %0, %cst_3 [2] : vector<2x4x256xf32> to vector<2x4xf32>
    %6 = vector.shape_cast %5 : vector<2x4xf32> to vector<2x4x1xf32>
    %c0_4 = arith.constant 0 : index
    %c0_5 = arith.constant 0 : index
    %7 = vector.load %arg2[%c0_4, %c0_5] : memref<8x4xf32, #tpu.memory_space<vmem>>, vector<8x4xf32>
    %c0_6 = arith.constant 0 : index
    %c0_7 = arith.constant 0 : index
    %8 = vector.load %arg3[%c0_6, %c0_7] : memref<8x4xf32, #tpu.memory_space<vmem>>, vector<8x4xf32>
    %9 = vector.shape_cast %7 : vector<8x4xf32> to vector<1x8x4xf32>
    %10 = vector.broadcast %9 : vector<1x8x4xf32> to vector<2x8x4xf32>
    %11 = vector.shape_cast %8 : vector<8x4xf32> to vector<1x8x4xf32>
    %12 = vector.broadcast %11 : vector<1x8x4xf32> to vector<2x8x4xf32>
    "tpu.trace_start"() <{level = 10 : i32, message = "bmc,bcx->bmx"}> : () -> ()
    %cst_8 = arith.constant dense<0.000000e+00> : vector<2x8x1xf32>
    %13 = tpu.matmul %10, %4, %cst_8 {dimension_numbers = #tpu.dot_dimension_numbers<[2], [1], [1], [2], [0, 0, 0, 1, 1, 2], [0], [0]>} : vector<2x8x4xf32>, vector<2x4x1xf32>, vector<2x8x1xf32> -> vector<2x8x1xf32>
    %cst_9 = arith.constant dense<0.000000e+00> : vector<2x8x1xf32>
    %14 = tpu.matmul %12, %6, %cst_9 {dimension_numbers = #tpu.dot_dimension_numbers<[2], [1], [1], [2], [0, 0, 0, 1, 1, 2], [0], [0]>} : vector<2x8x4xf32>, vector<2x4x1xf32>, vector<2x8x1xf32> -> vector<2x8x1xf32>
    "tpu.trace_stop"() : () -> ()
    %15 = arith.addf %13, %14 : vector<2x8x1xf32>
    %c0_10 = arith.constant 0 : index
    %c0_11 = arith.constant 0 : index
    %16 = vector.load %arg4[%c0_10, %c0_11] : memref<8x1xf32, #tpu.memory_space<vmem>>, vector<8x1xf32>
    %17 = vector.shape_cast %16 : vector<8x1xf32> to vector<1x8x1xf32>
    %18 = vector.broadcast %17 : vector<1x8x1xf32> to vector<2x8x1xf32>
    %19 = arith.addf %15, %18 : vector<2x8x1xf32>
    %cst_12 = arith.constant 0.000000e+00 : f32
    %cst_13 = arith.constant 6.000000e+00 : f32
    %20 = vector.broadcast %cst_12 : f32 to vector<2x8x1xf32>
    %21 = arith.maximumf %20, %19 : vector<2x8x1xf32>
    %22 = vector.broadcast %cst_13 : f32 to vector<2x8x1xf32>
    %23 = arith.minimumf %22, %21 : vector<2x8x1xf32>
    %c0_14 = arith.constant 0 : index
    %c0_15 = arith.constant 0 : index
    %24 = vector.load %arg5[%c0_14, %c0_15] : memref<8x8xf32, #tpu.memory_space<vmem>>, vector<8x8xf32>
    %25 = vector.shape_cast %24 : vector<8x8xf32> to vector<1x8x8xf32>
    %26 = vector.broadcast %25 : vector<1x8x8xf32> to vector<2x8x8xf32>
    "tpu.trace_start"() <{level = 10 : i32, message = "bcm,bmx->bcx"}> : () -> ()
    %cst_16 = arith.constant dense<0.000000e+00> : vector<2x8x1xf32>
    %27 = tpu.matmul %26, %23, %cst_16 {dimension_numbers = #tpu.dot_dimension_numbers<[2], [1], [1], [2], [0, 0, 0, 1, 1, 2], [0], [0]>} : vector<2x8x8xf32>, vector<2x8x1xf32>, vector<2x8x1xf32> -> vector<2x8x1xf32>
    "tpu.trace_stop"() : () -> ()
    %c0_17 = arith.constant 0 : index
    %c0_18 = arith.constant 0 : index
    %28 = vector.load %arg6[%c0_17, %c0_18] : memref<8x1xf32, #tpu.memory_space<vmem>>, vector<8x1xf32>
    %29 = vector.shape_cast %28 : vector<8x1xf32> to vector<1x8x1xf32>
    %30 = vector.broadcast %29 : vector<1x8x1xf32> to vector<2x8x1xf32>
    %31 = arith.addf %27, %30 : vector<2x8x1xf32>
    %32 = vector.extract_strided_slice %31 {offsets = [0, 0, 0], sizes = [2, 4, 1], strides = [1, 1, 1]} : vector<2x8x1xf32> to vector<2x4x1xf32>
    %33 = vector.extract_strided_slice %31 {offsets = [0, 4, 0], sizes = [2, 4, 1], strides = [1, 1, 1]} : vector<2x8x1xf32> to vector<2x4x1xf32>
    %34 = arith.negf %32 : vector<2x4x1xf32>
    %35 = math.exp %34 : vector<2x4x1xf32>
    %cst_19 = arith.constant 1.000000e+00 : f32
    %36 = vector.broadcast %cst_19 : f32 to vector<2x4x1xf32>
    %37 = arith.addf %36, %35 : vector<2x4x1xf32>
    %38 = arith.divf %36, %37 : vector<2x4x1xf32>
    %cst_20 = arith.constant 1.000000e-03 : f32
    %39 = vector.broadcast %cst_20 : f32 to vector<2x4x1xf32>
    %40 = arith.mulf %32, %39 : vector<2x4x1xf32>
    %41 = arith.addf %38, %40 : vector<2x4x1xf32>
    %42 = vector.broadcast %41 : vector<2x4x1xf32> to vector<2x4x256xf32>
    %43 = arith.mulf %0, %42 : vector<2x4x256xf32>
    %44 = vector.broadcast %33 : vector<2x4x1xf32> to vector<2x4x256xf32>
    %45 = arith.addf %43, %44 : vector<2x4x256xf32>
    %c0_21 = arith.constant 0 : index
    %c0_22 = arith.constant 0 : index
    %c0_23 = arith.constant 0 : index
    %46 = vector.load %arg7[%c0_21, %c0_22, %c0_23] : memref<2x4x256xf32, #tpu.memory_space<vmem>>, vector<2x4x256xf32>
    tpu.vector_store %arg7[%c0_21, %c0_22, %c0_23], %45 {strides = array<i32>} : memref<2x4x256xf32, #tpu.memory_space<vmem>>, vector<2x4x256xf32>,
    return
  }
  func.func @transform_0(%arg0: i32) -> (i32, i32, i32) {
    %c0_i32 = arith.constant 0 : i32
    %c0_i32_0 = arith.constant 0 : i32
    %c0_i32_1 = arith.constant 0 : i32
    return %arg0, %c0_i32, %c0_i32_0 : i32, i32, i32
  }
  func.func @transform_1(%arg0: i32) -> (i32, i32) {
    %c0_i32 = arith.constant 0 : i32
    %c0_i32_0 = arith.constant 0 : i32
    %c0_i32_1 = arith.constant 0 : i32
    return %c0_i32, %c0_i32_0 : i32, i32
  }
  func.func @transform_2(%arg0: i32) -> (i32, i32) {
    %c0_i32 = arith.constant 0 : i32
    %c0_i32_0 = arith.constant 0 : i32
    %c0_i32_1 = arith.constant 0 : i32
    return %c0_i32, %c0_i32_0 : i32, i32
  }
  func.func @transform_3(%arg0: i32) -> (i32, i32) {
    %c0_i32 = arith.constant 0 : i32
    %c0_i32_0 = arith.constant 0 : i32
    %c0_i32_1 = arith.constant 0 : i32
    return %c0_i32, %c0_i32_0 : i32, i32
  }
  func.func @transform_4(%arg0: i32) -> (i32, i32) {
    %c0_i32 = arith.constant 0 : i32
    %c0_i32_0 = arith.constant 0 : i32
    %c0_i32_1 = arith.constant 0 : i32
    return %c0_i32, %c0_i32_0 : i32, i32
  }
  func.func @transform_5(%arg0: i32) -> (i32, i32) {
    %c0_i32 = arith.constant 0 : i32
    %c0_i32_0 = arith.constant 0 : i32
    %c0_i32_1 = arith.constant 0 : i32
    return %c0_i32, %c0_i32_0 : i32, i32
  }
  func.func @transform_6(%arg0: i32) -> (i32, i32, i32) {
    %c0_i32 = arith.constant 0 : i32
    %c0_i32_0 = arith.constant 0 : i32
    %c0_i32_1 = arith.constant 0 : i32
    return %arg0, %c0_i32, %c0_i32_0 : i32, i32, i32
  }
}

</mosaic_0001>

<bundles_post_ra>
// kernel: tpu_custom_call.1
= control target key start
LH: loop header
LB: loop body
LE: loop exit
PB: predicated region body
PF: predicated region fallthrough
CT: control target
= control target key end

     0   :  { %11 = vsyncpa [#allocation3], 0  ;;  %s1278_s0 = inlined_call_operand.vmem [shape: f32[4,4,256], index: 0, kind: input, shape index: {}]   ;;  %s1279_s1 = inlined_call_operand.vmem [shape: f32[8,4], index: 1, kind: input, shape index: {}]   ;;  %s1280_s2 = inlined_call_operand.vmem [shape: f32[8,4], index: 2, kind: input, shape index: {}]   ;;  %s1281_s3 = inlined_call_operand.vmem [shape: f32[8,1], index: 3, kind: input, shape index: {}]   ;;  %s1282_s4 = inlined_call_operand.vmem [shape: f32[8,8], index: 4, kind: input, shape index: {}]   ;;  %s1283_s5 = inlined_call_operand.vmem [shape: f32[8,1], index: 5, kind: input, shape index: {}]   ;;  %s1284_s6 = inlined_call_operand.hbm [shape: f32[4,4,256], index: 6, kind: output, shape index: {}]  }
   0x1   :  { %13 = vsyncpa [#allocation3 + $0x1], 0  ;;  %s1125_s21 = smov 0   ;;  %s1127_s22 = smov 0  }
   0x2   :  { %s1129_s23 = smov 0   ;;  %s1131_s24 = smov 0  }
   0x3 LB: > { %s1146_s25 = sadd.s32 4294967295, %s1080_s24   ;;  %s889_s26 = sadd.s32 4294967294, %s1080_s24   ;;  %s1080_s24 = sphi %s1131_s24, %s1290_s24   ;;  %s1076_s23 = sphi %s1129_s23, %s1289_s23   ;;  %s1072_s22 = sphi %s1127_s22, %s1288_s22   ;;  %s1068_s21 = sphi %s1125_s21, %s1287_s21  }
   0x4   : > { %s1150_s27 = sadd.s32 1, %s1080_s24   ;;  %s157_s28 = sadd.s32 1, %s1076_s23 }
   0x5   : > { %s154_s29 = ssub.s32 %s1080_s24, %s1150_s27  ;;  %p167_p0 = scmp.ne.s32.totalorder %s1076_s23, %s1072_s22 }
   0x6   : > { %p155_p1 = scmp.eq.s32.totalorder %s154_s29, 0  ;;  %p168_p2 = scmp.eq.s32.totalorder %s1146_s25, 1 }
   0x7   : > { %p173_p3 = scmp.ne.s32.totalorder %s1072_s22, %s1068_s21  ;;  %p174_p4 = scmp.eq.s32.totalorder %s889_s26, 1 }
   0x8   : > { %s1161_s30 = scalar_select %p155_p1, %s1076_s23, %s157_s28  }
   0x9   : > { %p1163_p5 = por %p168_p2, %p167_p0  ;;  %p1167_p6 = por %p174_p4, %p173_p3 }
   0xa   : > { %p892_p7 = scmp.ge.s32.totalorder %s1080_s24, 1  ;;  %p217_p8 = scmp.lt.s32.totalorder %s1080_s24, 3 }
   0xc   : > { %p218_p9 = pnand %p892_p7, %p217_p8 }
   0xd   : > { %s894_s9 = sshll.u32 (!%p218_p9), %s1146_s25, 1  ;;  %v1082_v0 = vmov (!%p218_p9), 0.0   ;;  %vm264_vm0 = vcmask (!%p218_p9), 1043456   ;;  %vm1083_vm1 = vmmov (!%p218_p9), 0   ;;  %v289_v17 = vld [vmem:[%s1280_s2] sm:$0xff] (!%p218_p9)  ;;  %vm290_vm2 = vcmask (!%p218_p9), 31744  }
   0xe   : > { %221 = sbr.rel (%p218_p9) target bundleno = 795 (0x31b), region = 44  ;;  %p249_p10 = scmp.lt.s32.totalorder (!%p218_p9), %s894_s9, 3  ;;  %930 = vmatprep.subr.mxu0 (!%p218_p9), %v1082_v0  ;;  %935 = vmatprep.subr.mxu1 (!%p218_p9), %v1082_v0  ;;  %v288_v21 = vld [vmem:[%s1279_s1] sm:$0xff] (!%p218_p9)  ;;  %vm598_vm3 = vcmask (!%p218_p9), 64512   ;;  %v1084_v43 = vmov (!%p218_p9), 0  }
   0xf   : > { %932 = vmatprep.mubr.msk.f32.mxu0 (!%p218_p9), %vm1083_vm1, %v1082_v0  ;;  %937 = vmatprep.mubr.msk.f32.mxu1 (!%p218_p9), %vm1083_vm1, %v1082_v0  ;;  %v589_v29 = vld [vmem:[%s1281_s3] sm:$0xff] (!%p218_p9)  ;;  %v1085_v63 = vmov (!%p218_p9), 839922192  }
  0x10   : > { %v596_v40 = vld [vmem:[%s1282_s4] sm:$0xff] (!%p218_p9)  ;;  %1007 = vset.pattern.permute.xlu1 (!%p218_p9), %v1084_v43  ;;  %1006 = vset.pattern.permute.xlu0 (!%p218_p9), %v1084_v43 }
  0x11   : > { %v597_v44 = vld [vmem:[%s1283_s5] sm:$0xff] (!%p218_p9) }
  0x15   : > { %s1292_s9 = smov (!%p249_p10, %s894_s9), 3 }
  0x16   : > { %s915_s10 = sshll.u32 %s1292_s9, 3  ;;  %s245_s9 = sand.u32 1, %s1072_s22  }
  0x17   : > { %s253_s13 = scalar_lea.vmem %s1278_s0, %s915_s10  ;;  %s893_s10 = sshll.u32 %s245_s9, 4 }
  0x18   : > { %v1177_v1 = vld [vmem:[%s253_s13] sm:$0xff]  ;;  %v1179_v2 = vld [vmem:[%s253_s13 + $0x8] sm:$0xff]  ;;  %s247_s11 = scalar_lea.vmem [#allocation2], %s893_s10  ;;  %s917_s13 = sshll.u32 %s1146_s25, 8 }
  0x19   : > { %v260_v3 = vcombine.high %v1177_v1, %v1177_v1  ;;  %v278_v4 = vsel %vm264_vm0, %v1177_v1, -inf  ;;  %v265_v5 = vsel %vm264_vm0, %v1177_v1, 0.0  ;;  %v261_v6 = vcombine.high %v1179_v2, %v1179_v2  ;;  %s827_s12 = sshll.u32 %s247_s11, 4  ;;  %s1235_s16 = scalar_lea.hbm %s1284_s6, %s917_s13  ;;  %s1230_s12 = int_to_ptr.vmem [resolvable:$true] %s827_s12 }
  0x1a   : > { %v283_v7 = vsel %vm264_vm0, %v1179_v2, -inf  ;;  %v270_v8 = vsel %vm264_vm0, %v1179_v2, 0.0  ;;  %s1237_s17 = scalar_lea.sflag [#allocation3], %s245_s9  ;;  %s1018_s18 = scalar_lea.vmem %s1230_s12, 256 }
  0x1b   : > { %v279_v9 = vsel %vm264_vm0, %v260_v3, -inf  ;;  %v266_v10 = vsel %vm264_vm0, %v260_v3, 0.0  ;;  %v284_v11 = vsel %vm264_vm0, %v261_v6, -inf  ;;  %v271_v12 = vsel %vm264_vm0, %v261_v6, 0.0  ;;  %p1019_p11 = scmp.ne.s32.totalorder %s1230_s12, %s1018_s18  ;;  %s1087_s25 = smov [#allocation2]  }
  0x1c   : > { %v280_v13 = vmax.f32 %v278_v4, %v279_v9  ;;  %v267_v14 = vadd.f32 %v266_v10, %v265_v5  ;;  %v285_v15 = vmax.f32 %v283_v7, %v284_v11  ;;  %v272_v16 = vadd.f32 %v271_v12, %v270_v8  ;;  %s1022_s19 = sshll.u32 %s1087_s25, 4  ;;  %s1023_s19 = int_to_ptr.vmem [resolvable:$false] %s1022_s19 }
  0x1d   : > { %v769_v3 = vlaneseq  ;;  %v1086_v4 = vmov 1985246804   ;;  %p1020_p12 = pnand %p1019_p11, %p1163_p5  ;;  %s1024_s20 = scalar_lea.vmem %s1023_s19, 512 }
  0x1e   : > { %281 = vmax.xlane.f32.xlu0 %v280_v13  ;;  %268 = vadd.xlane.f32.xlu1 %v267_v14  ;;  %v793_v5 = vunpack.c.l.s4 %v1086_v4  ;;  %p1025_p0 = scmp.lt.s32.totalorder %s1230_s12, %s1023_s19  ;;  %p1026_p1 = scmp.lt.s32.totalorder %s1024_s20, %s1018_s18 }
  0x1f   : > { %v770_v7 = vshrl.u32 %v769_v3, 7  ;;  %p1021_p13 = pneg %p1020_p12 }
  0x20   : > { %v794_v8 = vunpack.c.0.s8 %v793_v5  ;;  %p1027_p2 = por %p1026_p1, %p1025_p0 }
  0x22   : > { %286 = vmax.xlane.f32.xlu0 %v285_v15  ;;  %273 = vadd.xlane.f32.xlu1 %v272_v16  ;;  %v797_v10 = vsub.s32 %v794_v8, %v770_v7  ;;  %p1028_p3 = pnand %p1027_p2, %p1021_p13 }
  0xab   : > { %v282_v18 = vpop.xlane.xlu0 %281  ;;  %v269_v19 = vpop.xlane.xlu1 %268 }
  0xac   : > { %931 = vmatpush3.msk.msra.mxu0 %vm264_vm0, %v282_v18  ;;  %v276_v20 = vmul.f32 0.00390625, %v269_v19 }
  0xad   : > { %933 = vmatmul.mubr.msk.f32.vlgmr.msra.gmra.mrb[0].mxu0 %vm290_vm2, %v289_v17  ;;  %940 = vmatprep.subr.mxu0 %v1082_v0 }
  0xae   : > { %941 = vmatpush3.msk.msra.mxu0 %vm264_vm0, %v276_v20  ;;  %942 = vmatprep.mubr.msk.f32.mxu0 %vm1083_vm1, %v1082_v0 }
  0xaf   : > { %v287_v22 = vpop.xlane.xlu0 %286  ;;  %v274_v23 = vpop.xlane.xlu1 %273  ;;  %950 = vmatprep.subr.mxu0 %v1082_v0 }
  0xb0   : > { %936 = vmatpush3.msk.msra.mxu1 %vm264_vm0, %v287_v22  ;;  %v277_v24 = vmul.f32 0.00390625, %v274_v23 }
  0xb1   : > { %938 = vmatmul.mubr.msk.f32.vlgmr.msra.gmra.mrb[0].mxu1 %vm290_vm2, %v289_v17  ;;  %943 = vmatmul.mubr.msk.f32.vlgmr.msra.gmra.mrb[2].mxu0 %vm290_vm2, %v288_v21 }
  0xb2   : > { %945 = vmatprep.subr.mxu1 %v1082_v0  ;;  %947 = vmatprep.mubr.msk.f32.mxu1 %vm1083_vm1, %v1082_v0 }
  0xb3   : > { %946 = vmatpush3.msk.msra.mxu1 %vm264_vm0, %v277_v24  ;;  %952 = vmatprep.mubr.msk.f32.mxu0 %vm1083_vm1, %v1082_v0 }
  0xb4   : > { %955 = vmatprep.subr.mxu1 %v1082_v0 }
  0xb5   : > { %948 = vmatmul.mubr.msk.f32.vlgmr.msra.gmra.mrb[2].mxu1 %vm290_vm2, %v288_v21 }
  0xb6   : > { %957 = vmatprep.mubr.msk.f32.mxu1 %vm1083_vm1, %v1082_v0  ;;  %v767_v0 = vunpack.c.l.s4 %v1085_v63 }
  0xb8   : > { %v768_v6 = vunpack.c.0.s8 %v767_v0 }
  0xba   : > { %v771_v9 = vsub.s32 %v768_v6, %v770_v7 }
 0x180   : > { %v363_v25 = vpop.f32.mrb[0].mxu0 }
 0x181   : > { %v934_v26 = vpop.f32.mrb[1].mxu0 }
 0x184   : > { %v436_v27 = vpop.f32.mrb[0].mxu1  ;;  %v512_v28 = vpop.f32.mrb[2].mxu0 }
 0x185   : > { %v513_v30 = vadd.f32 %v512_v28, %v363_v25  ;;  %v939_v31 = vpop.f32.mrb[1].mxu1  ;;  %v944_v32 = vpop.f32.mrb[3].mxu0 }
 0x187   : > { %v590_v33 = vadd.f32 %v589_v29, %v513_v30 }
 0x188   : > { %v585_v34 = vpop.f32.mrb[2].mxu1 }
 0x189   : > { %v592_v35 = vmax.f32 %v590_v33, 0.0  ;;  %v586_v36 = vadd.f32 %v585_v34, %v436_v27  ;;  %v949_v37 = vpop.f32.mrb[3].mxu1 }
 0x18b   : > { %v594_v38 = vmin.f32 %v592_v35, 6.0  ;;  %v591_v39 = vadd.f32 %v589_v29, %v586_v36 }
 0x18d   : > { %v593_v41 = vmax.f32 %v591_v39, 0.0  ;;  %951 = vmatpush3.msra.mxu0 %v594_v38 }
 0x18e   : > { %953 = vmatmul.mubr.msk.f32.vlgmr.msra.gmra.mrb[4].mxu0 %vm598_vm3, %v596_v40 }
 0x18f   : > { %v595_v42 = vmin.f32 %v593_v41, 6.0 }
 0x191   : > { %956 = vmatpush3.msra.mxu1 %v595_v42 }
 0x192   : > { %958 = vmatmul.mubr.msk.f32.vlgmr.msra.gmra.mrb[4].mxu1 %vm598_vm3, %v596_v40 }
 0x261   : > { %v668_v45 = vpop.f32.mrb[4].mxu0 }
 0x262   : > { %v669_v46 = vadd.f32 %v668_v45, %v597_v44  ;;  %v954_v47 = vpop.f32.mrb[5].mxu0 }
 0x264   : > { %v907_v48 = vmul.f32 -1.442695, %v669_v46  ;;  %786 = vperm.xlu1 %1007, %v669_v46   ;;  %v754_v57 = vmul.f32 0.001, %v669_v46 }
 0x265   : > { %v738_v49 = vpop.f32.mrb[4].mxu1 }
 0x266   : > { %1010 = vpow2.f32 %v907_v48  ;;  %v739_v50 = vadd.f32 %v738_v49, %v597_v44  ;;  %v959_v51 = vpop.f32.mrb[5].mxu1 }
 0x268   : > { %v908_v52 = vmul.f32 -1.442695, %v739_v50  ;;  %v755_v60 = vmul.f32 0.001, %v739_v50 }
 0x26a   : > { %1012 = vpow2.f32 %v908_v52 }
 0x270   : > { %v1011_v53 = vpop.eup %1010 }
 0x271   : > { %v748_v54 = vadd.f32 1.0, %v1011_v53 }
 0x273   : > { %1014 = vrcp.f32 %v748_v54 }
 0x274   : > { %v1013_v55 = vpop.eup %1012 }
 0x275   : > { %v749_v56 = vadd.f32 1.0, %v1013_v55 }
 0x277   : > { %1016 = vrcp.f32 %v749_v56 }
 0x27d   : > { %v1015_v58 = vpop.eup %1014 }
 0x27e   : > { %v756_v59 = vadd.f32 %v1015_v58, %v754_v57 }
 0x280   : > { %760 = vperm.xlu0 %1006, %v756_v59  }
 0x281   : > { %v1017_v61 = vpop.eup %1016 }
 0x282   : > { %v757_v62 = vadd.f32 %v1017_v61, %v755_v60 }
 0x284   : > { %764 = vperm.xlu1 %1007, %v757_v62  }
 0x288   : > { %790 = vperm.xlu1 %1007, %v739_v50  }
 0x2e3   : > { %v787_v11 = vpop.permute.xlu1 %786 }
 0x2e4   : > { %v798_v14 = vrot.slane %v787_v11, %v797_v10 }
 0x2ff   : > { %v761_v12 = vpop.permute.xlu0 %760 }
 0x300   : > { %v772_v13 = vrot.slane %v761_v12, %v771_v9 }
 0x302   : > { %v782_v15 = vmul.f32 %v772_v13, %v1177_v1 }
 0x303   : > { %v765_v16 = vpop.permute.xlu1 %764 }
 0x304   : > { %v808_v17 = vadd.f32 %v798_v14, %v782_v15  ;;  %v779_v18 = vrot.slane %v765_v16, %v771_v9 }
 0x306   : > { %810 = vst [vmem:[%s247_s11] sm:$0xff] %v808_v17  ;;  %v783_v20 = vmul.f32 %v779_v18, %v1179_v2 }
 0x307   : > { %v791_v19 = vpop.permute.xlu1 %790 }
 0x308   : > { %v805_v21 = vrot.slane %v791_v19, %v797_v10 }
 0x30a   : > { %v809_v1 = vadd.f32 %v805_v21, %v783_v20 }
 0x30c   : > { %811 = vst [vmem:[%s247_s11 + $0x8] sm:$0xff] %v809_v1 }
 0x30d   : > { %1031 = shalt.err (!%p1028_p3)
}
 0x30e   : > { %s1032_s26 = scalar_lea.hbm %s1235_s16, 256  ;;  %s1036_s9 = scalar_lea.hbm %s1284_s6, 512 }
 0x30f   : > { %p1033_p4 = scmp.ne.s32.totalorder %s1235_s16, %s1032_s26  ;;  %p1037_p9 = scmp.lt.u32.totalorder %s1235_s16, %s1284_s6 }
 0x310   : > { %p1038_p10 = scmp.lt.u32.totalorder %s1036_s9, %s1032_s26  ;;  %p1040_p12 = scmp.lt.u32.totalorder %s1032_s26, %s1235_s16 }
 0x311   : > { %p1034_p7 = pnand %p1033_p4, %p1163_p5 }
 0x312   : > { %p1039_p11 = por %p1038_p10, %p1037_p9 }
 0x313   : > { %p1035_p8 = pneg %p1034_p7 }
 0x314   : > { %p1041_p13 = por %p1040_p12, %p1039_p11 }
 0x316   : > { %p1042_p0 = pnand %p1041_p13, %p1035_p8 }
 0x318   : > { %1045 = shalt.err (!%p1042_p0)
}
 0x319   : > { %s1088_s13 = smov 128   ;;  %s1089_s14 = smov 8  }
 0x31a   : > { %960 = dma.vmem_to_hbm [thread:$0]  (%p1163_p5), %s1230_s12, 256, %s1235_s16, %s1237_s17, %s1088_s13, %s1088_s13, %s1089_s14  }
 0x31b PF: > { %p966_p1 = scmp.ge.s32.totalorder %s1080_s24, 2  ;;  %s842_s15 = sand.u32 1, %s1068_s21  }
 0x31c   : > { %s843_s18 = scalar_lea.sflag [#allocation3], %s842_s15 }
 0x31d   : > { %p963_p2 = pnand %p966_p1, %p1167_p6 }
 0x31f   : > { %1063 = dma.done.wait (!%p963_p2), %s843_s18, 256  }
 0x320   : > { %1065 = vsyncadd (!%p963_p2), %s843_s18, 4294967040  ;;  %p16_p3 = scmp.ge.s32.totalorder %s1150_s27, 4   ;;  %s1287_s21 = smov %s1072_s22 }
 0x321   : > { %s1288_s22 = smov %s1076_s23  ;;  %s1289_s23 = smov %s1161_s30 }
 0x322   : > { %s1290_s24 = smov %s1150_s27  ;;  %18 = sbr.rel (!%p16_p3) target bundleno = 3 (0x3), region = 79 }
 0x329   :  { %848 = vsyncpa [#allocation3], 1 }
 0x32a   :  { %850 = vsyncpa [#allocation3 + $0x1], 1 }

</bundles_post_ra>
